<compile_context>
chip_gen: v5e
topology: v5e:2x2
jax: 0.10.0
libtpu: 0.0.40
codegen_flags: <defaults>
</compile_context>

<pallas_src>
import functools

import jax
import jax.numpy as jnp
from jax.experimental import pallas as pl


# ---------------------------------------------------------------------------
# Helpers
# ---------------------------------------------------------------------------
def _rup(x, m):
    return ((x + m - 1) // m) * m


def _pad_to(x, shape):
    pads = [(0, s - d) for d, s in zip(x.shape, shape)]
    return jnp.pad(x, pads)


def _full_spec(shape):
    # Whole-array block (no grid): index_map takes no grid args.
    return pl.BlockSpec(shape, lambda: (0,) * len(shape))


# ---------------------------------------------------------------------------
# Fused Pallas kernel: all GCN layers + pooling + MLP head
# ---------------------------------------------------------------------------
def fused_gcn_kernel(nb_layers, a_ref, x_ref, p_ref, w_ref, bh_ref,
                     fc3w_ref, bo_ref, o_ref):
    """out = fc3(relu(fc2(relu(fc1(P @ h_L))))),  h_l = relu(A @ (h_{l-1} W_l) + b_l).

    w_ref  : (nb_layers+2, D, D)  conv1..L, fc1, fc2 weights (zero-padded)
    bh_ref : (nb_layers+2, D)     matching biases (f32, zero-padded)
    fc3w_ref: (D, Cp), bo_ref: (1, Cp)  output-width (lane-dense) head
    """
    # TODO(synk): at large N do not hold the full adjacency live across all
    # layers; re-stream per-tile slices via a grid instead.
    a = a_ref[...]          # (Np, Np) bf16, resident for the whole kernel
    h = x_ref[...]          # (Np, D)  bf16 (feature dim zero-padded to D)

    # GCN layers: h = relu(A @ (h @ W_l) + b_l); h stays in VMEM/vregs.
    for li in range(nb_layers):
        hw = jnp.dot(h, w_ref[li], preferred_element_type=jnp.float32)
        h = jnp.dot(a, hw.astype(jnp.bfloat16),
                    preferred_element_type=jnp.float32)
        h = h + bh_ref[li:li + 1, :]
        h = jnp.maximum(h, 0.0).astype(jnp.bfloat16)

    # global_add_pool as P @ h.
    pooled = jnp.dot(p_ref[...], h, preferred_element_type=jnp.float32)

    # fc1 / relu   (dropout: identity, eval semantics)
    h1 = jnp.dot(pooled.astype(jnp.bfloat16), w_ref[nb_layers],
                 preferred_element_type=jnp.float32)
    h1 = jnp.maximum(h1 + bh_ref[nb_layers:nb_layers + 1, :], 0.0)

    # fc2 / relu   (weight/bias cols >= D//2 are exactly zero => cols stay 0)
    h2 = jnp.dot(h1.astype(jnp.bfloat16), w_ref[nb_layers + 1],
                 preferred_element_type=jnp.float32)
    h2 = jnp.maximum(h2 + bh_ref[nb_layers + 1:nb_layers + 2, :], 0.0)

    # fc3 -> lane-dense (Bp, Cp) f32 store.
    out = jnp.dot(h2.astype(jnp.bfloat16), fc3w_ref[...],
                  preferred_element_type=jnp.float32) + bo_ref[...]
    o_ref[...] = out.astype(o_ref.dtype)


def fused_gcn_forward(a, x, p, w, b_hidden, fc3_w, b_out, nb_layers):
    """One pallas_call for the whole network on packed/padded operands."""
    n_p = a.shape[0]
    d = x.shape[1]
    b_p = p.shape[0]
    c_p = fc3_w.shape[1]

    args = [a, x, p, w, b_hidden, fc3_w, b_out]

    flops = (nb_layers * (2 * n_p * d * d + 2 * n_p * n_p * d)
             + 2 * b_p * n_p * d          # pooling
             + 2 * b_p * d * d            # fc1
             + 2 * b_p * d * d            # fc2 (padded width)
             + 2 * b_p * d * c_p)         # fc3
    bytes_accessed = sum(int(arr.size) * arr.dtype.itemsize for arr in args)
    bytes_accessed += b_p * c_p * 4       # f32 output

    return pl.pallas_call(
        functools.partial(fused_gcn_kernel, nb_layers),
        out_shape=jax.ShapeDtypeStruct((b_p, c_p), jnp.float32),
        in_specs=[_full_spec(arr.shape) for arr in args],
        out_specs=_full_spec((b_p, c_p)),
        cost_estimate=pl.CostEstimate(flops=int(flops), transcendentals=0,
                                      bytes_accessed=int(bytes_accessed)),
    )(*args)


# ---------------------------------------------------------------------------
# Graph-static preprocessing (hoisted out of the per-call hot path)
# ---------------------------------------------------------------------------
def build_norm_adj(edge_index, num_nodes):
    """Dense GCN-normalized adjacency with self-loops: D^-1/2 (A+I) D^-1/2."""
    src = edge_index[0]
    dst = edge_index[1]
    a = jnp.zeros((num_nodes, num_nodes), jnp.float32).at[dst, src].add(1.0)
    a = a + jnp.eye(num_nodes, dtype=jnp.float32)
    deg = a.sum(axis=1)
    dinv = jnp.where(deg > 0, 1.0 / jnp.sqrt(deg), 0.0)
    return dinv[:, None] * a * dinv[None, :]


def build_pool_matrix(batch, num_graphs):
    """P[g, n] = 1 iff node n belongs to graph g  =>  P @ X == global_add_pool."""
    return (batch[None, :] == jnp.arange(num_graphs)[:, None]).astype(jnp.float32)


def prepare_graph(x, edge_index, batch, num_graphs, d_model):
    """Build A_norm / P and the padded bf16 operands ONCE (graph is static)."""
    n = x.shape[0]
    in_size = x.shape[1]
    assert in_size <= d_model, "feature padding assumes in_size <= d_model"

    n_p = _rup(n, 16)                    # bf16 sublane packing
    b_p = _rup(max(num_graphs, 1), 16)   # bf16 sublane packing for P / output rows

    a_norm = build_norm_adj(edge_index, n)
    pool_mat = build_pool_matrix(batch, num_graphs)

    a_p = _pad_to(a_norm, (n_p, n_p)).astype(jnp.bfloat16)
    # Feature (lane) dim zero-padded only to d_model; matching conv1 weight
    # rows are zero-padded, so the product is exact.
    x_p = _pad_to(x, (n_p, d_model)).astype(jnp.bfloat16)
    p_p = _pad_to(pool_mat, (b_p, n_p)).astype(jnp.bfloat16)
    return a_p, x_p, p_p


# ---------------------------------------------------------------------------
# Parameter init + packing
# ---------------------------------------------------------------------------
def init_packed_params(key, in_size, d_model, nb_class, nb_layers):
    """Deterministic init, packed for the fused kernel.

    Packing (all zero-padding is exact: padded rows/cols never contribute):
      w        (nb_layers+2, D, D) bf16 : conv1..L, fc1, fc2 weights
      b_hidden (nb_layers+2, D)    f32  : matching biases
      fc3_w    (D, Cp)             bf16 : rows >= D//2 zero, cols >= nb_class zero
      b_out    (1, Cp)             f32
    """
    D = d_model
    H = d_model // 2
    Cp = _rup(nb_class, 128)             # lane-dense output store
    n_w = nb_layers + 2

    keys = jax.random.split(key, 2 * (nb_layers + 3))
    ki = iter(range(len(keys)))

    def dense(fin, fout):
        w = (jax.random.normal(keys[next(ki)], (fin, fout), jnp.float32)
             / jnp.sqrt(jnp.float32(fin)))
        b = jax.random.normal(keys[next(ki)], (fout,), jnp.float32) * 0.01
        return w, b

    w_pack = jnp.zeros((n_w, D, D), jnp.float32)
    b_hidden = jnp.zeros((n_w, D), jnp.float32)

    # conv1: in_size -> D (rows padded to D; they only ever meet zero-padded
    # feature columns).
    w, b = dense(in_size, D)
    w_pack = w_pack.at[0, :in_size, :].set(w)
    b_hidden = b_hidden.at[0].set(b)
    # conv2..L: D -> D
    for li in range(1, nb_layers):
        w, b = dense(D, D)
        w_pack = w_pack.at[li].set(w)
        b_hidden = b_hidden.at[li].set(b)
    # fc1: D -> D
    w, b = dense(D, D)
    w_pack = w_pack.at[nb_layers].set(w)
    b_hidden = b_hidden.at[nb_layers].set(b)
    # fc2: D -> H (output cols padded to D with zeros)
    w, b = dense(D, H)
    w_pack = w_pack.at[nb_layers + 1, :, :H].set(w)
    b_hidden = b_hidden.at[nb_layers + 1, :H].set(b)
    # fc3: H -> nb_class (rows padded to D, cols padded to Cp)
    w, b = dense(H, nb_class)
    fc3_w = jnp.zeros((D, Cp), jnp.float32).at[:H, :nb_class].set(w)
    b_out = jnp.zeros((1, Cp), jnp.float32).at[0, :nb_class].set(b)

    return {
        "w": w_pack.astype(jnp.bfloat16),
        "b_hidden": b_hidden,                 # f32
        "fc3_w": fc3_w.astype(jnp.bfloat16),
        "b_out": b_out,                       # f32
    }


# ---------------------------------------------------------------------------
# Hot-path forward: just the fused kernel + output slice
# ---------------------------------------------------------------------------
def gcn_forward(params, a_p, x_p, p_p, num_graphs, nb_class, nb_layers):
    out_p = fused_gcn_forward(a_p, x_p, p_p,
                              params["w"], params["b_hidden"],
                              params["fc3_w"], params["b_out"], nb_layers)
    return out_p[:num_graphs, :nb_class]


# ---------------------------------------------------------------------------
# Main
# ---------------------------------------------------------------------------
if __name__ == "__main__":
    IN_SIZE = 4       # node feature dim
    D_MODEL = 32      # hidden dim
    NB_CLASS = 3
    NB_LAYERS = 4
    NUM_GRAPHS = 2
    NODES_PER_GRAPH = 8
    N = NUM_GRAPHS * NODES_PER_GRAPH

    key = jax.random.PRNGKey(0)
    k_x, k_p = jax.random.split(key)

    # Node features [N, in_size]
    x = jax.random.normal(k_x, (N, IN_SIZE), jnp.float32)

    # Two disjoint ring graphs (bidirectional edges), edge_index [2, E]
    srcs, dsts = [], []
    for g in range(NUM_GRAPHS):
        off = g * NODES_PER_GRAPH
        for i in range(NODES_PER_GRAPH):
            j = (i + 1) % NODES_PER_GRAPH
            srcs += [off + i, off + j]
            dsts += [off + j, off + i]
    edge_index = jnp.array([srcs, dsts], dtype=jnp.int32)

    # Graph assignment per node [N]
    batch = jnp.repeat(jnp.arange(NUM_GRAPHS, dtype=jnp.int32), NODES_PER_GRAPH)

    params = init_packed_params(k_p, IN_SIZE, D_MODEL, NB_CLASS, NB_LAYERS)

    # Graph-static preprocessing done ONCE, outside the jitted hot path.
    a_p, x_p, p_p = prepare_graph(x, edge_index, batch, NUM_GRAPHS, D_MODEL)
    a_p, x_p, p_p = jax.block_until_ready((a_p, x_p, p_p))

    fwd = jax.jit(functools.partial(gcn_forward,
                                    num_graphs=NUM_GRAPHS,
                                    nb_class=NB_CLASS,
                                    nb_layers=NB_LAYERS))
    out = jax.block_until_ready(fwd(params, a_p, x_p, p_p))

    assert out.shape == (NUM_GRAPHS, NB_CLASS), out.shape
    assert out.dtype == jnp.float32
    assert bool(jnp.all(jnp.isfinite(out)))
    print("KERNEL_OK")
</pallas_src>

<mosaic_0001>
module attributes {stable_mosaic.version = 11 : i64} {
  func.func @fused_gcn_kernel(%arg0: memref<16x16xbf16, #tpu.memory_space<vmem>>, %arg1: memref<16x32xbf16, #tpu.memory_space<vmem>>, %arg2: memref<16x16xbf16, #tpu.memory_space<vmem>>, %arg3: memref<6x32x32xbf16, #tpu.memory_space<vmem>>, %arg4: memref<6x32xf32, #tpu.memory_space<vmem>>, %arg5: memref<32x128xbf16, #tpu.memory_space<vmem>>, %arg6: memref<1x128xf32, #tpu.memory_space<vmem>>, %arg7: memref<16x128xf32, #tpu.memory_space<vmem>>) attributes {dimension_semantics = [], scalar_prefetch = 0 : i64, scratch_operands = 0 : i64, tpu.core_type = #tpu.core_type<tc>} {
    %c0 = arith.constant 0 : index
    %c0_0 = arith.constant 0 : index
    %0 = vector.load %arg0[%c0, %c0_0] : memref<16x16xbf16, #tpu.memory_space<vmem>>, vector<16x16xbf16>
    %c0_1 = arith.constant 0 : index
    %c0_2 = arith.constant 0 : index
    %1 = vector.load %arg1[%c0_1, %c0_2] : memref<16x32xbf16, #tpu.memory_space<vmem>>, vector<16x32xbf16>
    %c0_3 = arith.constant 0 : index
    %c0_4 = arith.constant 0 : index
    %c0_5 = arith.constant 0 : index
    %2 = vector.load %arg3[%c0_3, %c0_4, %c0_5] : memref<6x32x32xbf16, #tpu.memory_space<vmem>>, vector<1x32x32xbf16>
    %3 = vector.shape_cast %2 : vector<1x32x32xbf16> to vector<32x32xbf16>
    %cst = arith.constant dense<0.000000e+00> : vector<16x32xf32>
    %4 = tpu.matmul %1, %3, %cst {dimension_numbers = #tpu.dot_dimension_numbers<[1], [0], [0], [1], [0, 0, 1, 1], [], []>} : vector<16x32xbf16>, vector<32x32xbf16>, vector<16x32xf32> -> vector<16x32xf32>
    %5 = arith.truncf %4 : vector<16x32xf32> to vector<16x32xbf16>
    %cst_6 = arith.constant dense<0.000000e+00> : vector<16x32xf32>
    %6 = tpu.matmul %0, %5, %cst_6 {dimension_numbers = #tpu.dot_dimension_numbers<[1], [0], [0], [1], [0, 0, 1, 1], [], []>} : vector<16x16xbf16>, vector<16x32xbf16>, vector<16x32xf32> -> vector<16x32xf32>
    %c0_7 = arith.constant 0 : index
    %c0_8 = arith.constant 0 : index
    %7 = vector.load %arg4[%c0_7, %c0_8] : memref<6x32xf32, #tpu.memory_space<vmem>>, vector<1x32xf32>
    %8 = vector.broadcast %7 : vector<1x32xf32> to vector<16x32xf32>
    %9 = arith.addf %6, %8 : vector<16x32xf32>
    %cst_9 = arith.constant 0.000000e+00 : f32
    %10 = vector.broadcast %cst_9 : f32 to vector<16x32xf32>
    %11 = arith.maximumf %9, %10 : vector<16x32xf32>
    %12 = arith.truncf %11 : vector<16x32xf32> to vector<16x32xbf16>
    %c1 = arith.constant 1 : index
    %c0_10 = arith.constant 0 : index
    %c0_11 = arith.constant 0 : index
    %13 = vector.load %arg3[%c1, %c0_10, %c0_11] : memref<6x32x32xbf16, #tpu.memory_space<vmem>>, vector<1x32x32xbf16>
    %14 = vector.shape_cast %13 : vector<1x32x32xbf16> to vector<32x32xbf16>
    %cst_12 = arith.constant dense<0.000000e+00> : vector<16x32xf32>
    %15 = tpu.matmul %12, %14, %cst_12 {dimension_numbers = #tpu.dot_dimension_numbers<[1], [0], [0], [1], [0, 0, 1, 1], [], []>} : vector<16x32xbf16>, vector<32x32xbf16>, vector<16x32xf32> -> vector<16x32xf32>
    %16 = arith.truncf %15 : vector<16x32xf32> to vector<16x32xbf16>
    %cst_13 = arith.constant dense<0.000000e+00> : vector<16x32xf32>
    %17 = tpu.matmul %0, %16, %cst_13 {dimension_numbers = #tpu.dot_dimension_numbers<[1], [0], [0], [1], [0, 0, 1, 1], [], []>} : vector<16x16xbf16>, vector<16x32xbf16>, vector<16x32xf32> -> vector<16x32xf32>
    %c1_14 = arith.constant 1 : index
    %c0_15 = arith.constant 0 : index
    %18 = vector.load %arg4[%c1_14, %c0_15] : memref<6x32xf32, #tpu.memory_space<vmem>>, vector<1x32xf32>
    %19 = vector.broadcast %18 : vector<1x32xf32> to vector<16x32xf32>
    %20 = arith.addf %17, %19 : vector<16x32xf32>
    %cst_16 = arith.constant 0.000000e+00 : f32
    %21 = vector.broadcast %cst_16 : f32 to vector<16x32xf32>
    %22 = arith.maximumf %20, %21 : vector<16x32xf32>
    %23 = arith.truncf %22 : vector<16x32xf32> to vector<16x32xbf16>
    %c2 = arith.constant 2 : index
    %c0_17 = arith.constant 0 : index
    %c0_18 = arith.constant 0 : index
    %24 = vector.load %arg3[%c2, %c0_17, %c0_18] : memref<6x32x32xbf16, #tpu.memory_space<vmem>>, vector<1x32x32xbf16>
    %25 = vector.shape_cast %24 : vector<1x32x32xbf16> to vector<32x32xbf16>
    %cst_19 = arith.constant dense<0.000000e+00> : vector<16x32xf32>
    %26 = tpu.matmul %23, %25, %cst_19 {dimension_numbers = #tpu.dot_dimension_numbers<[1], [0], [0], [1], [0, 0, 1, 1], [], []>} : vector<16x32xbf16>, vector<32x32xbf16>, vector<16x32xf32> -> vector<16x32xf32>
    %27 = arith.truncf %26 : vector<16x32xf32> to vector<16x32xbf16>
    %cst_20 = arith.constant dense<0.000000e+00> : vector<16x32xf32>
    %28 = tpu.matmul %0, %27, %cst_20 {dimension_numbers = #tpu.dot_dimension_numbers<[1], [0], [0], [1], [0, 0, 1, 1], [], []>} : vector<16x16xbf16>, vector<16x32xbf16>, vector<16x32xf32> -> vector<16x32xf32>
    %c2_21 = arith.constant 2 : index
    %c0_22 = arith.constant 0 : index
    %29 = vector.load %arg4[%c2_21, %c0_22] : memref<6x32xf32, #tpu.memory_space<vmem>>, vector<1x32xf32>
    %30 = vector.broadcast %29 : vector<1x32xf32> to vector<16x32xf32>
    %31 = arith.addf %28, %30 : vector<16x32xf32>
    %cst_23 = arith.constant 0.000000e+00 : f32
    %32 = vector.broadcast %cst_23 : f32 to vector<16x32xf32>
    %33 = arith.maximumf %31, %32 : vector<16x32xf32>
    %34 = arith.truncf %33 : vector<16x32xf32> to vector<16x32xbf16>
    %c3 = arith.constant 3 : index
    %c0_24 = arith.constant 0 : index
    %c0_25 = arith.constant 0 : index
    %35 = vector.load %arg3[%c3, %c0_24, %c0_25] : memref<6x32x32xbf16, #tpu.memory_space<vmem>>, vector<1x32x32xbf16>
    %36 = vector.shape_cast %35 : vector<1x32x32xbf16> to vector<32x32xbf16>
    %cst_26 = arith.constant dense<0.000000e+00> : vector<16x32xf32>
    %37 = tpu.matmul %34, %36, %cst_26 {dimension_numbers = #tpu.dot_dimension_numbers<[1], [0], [0], [1], [0, 0, 1, 1], [], []>} : vector<16x32xbf16>, vector<32x32xbf16>, vector<16x32xf32> -> vector<16x32xf32>
    %38 = arith.truncf %37 : vector<16x32xf32> to vector<16x32xbf16>
    %cst_27 = arith.constant dense<0.000000e+00> : vector<16x32xf32>
    %39 = tpu.matmul %0, %38, %cst_27 {dimension_numbers = #tpu.dot_dimension_numbers<[1], [0], [0], [1], [0, 0, 1, 1], [], []>} : vector<16x16xbf16>, vector<16x32xbf16>, vector<16x32xf32> -> vector<16x32xf32>
    %c3_28 = arith.constant 3 : index
    %c0_29 = arith.constant 0 : index
    %40 = vector.load %arg4[%c3_28, %c0_29] : memref<6x32xf32, #tpu.memory_space<vmem>>, vector<1x32xf32>
    %41 = vector.broadcast %40 : vector<1x32xf32> to vector<16x32xf32>
    %42 = arith.addf %39, %41 : vector<16x32xf32>
    %cst_30 = arith.constant 0.000000e+00 : f32
    %43 = vector.broadcast %cst_30 : f32 to vector<16x32xf32>
    %44 = arith.maximumf %42, %43 : vector<16x32xf32>
    %45 = arith.truncf %44 : vector<16x32xf32> to vector<16x32xbf16>
    %c0_31 = arith.constant 0 : index
    %c0_32 = arith.constant 0 : index
    %46 = vector.load %arg2[%c0_31, %c0_32] : memref<16x16xbf16, #tpu.memory_space<vmem>>, vector<16x16xbf16>
    %cst_33 = arith.constant dense<0.000000e+00> : vector<16x32xf32>
    %47 = tpu.matmul %46, %45, %cst_33 {dimension_numbers = #tpu.dot_dimension_numbers<[1], [0], [0], [1], [0, 0, 1, 1], [], []>} : vector<16x16xbf16>, vector<16x32xbf16>, vector<16x32xf32> -> vector<16x32xf32>
    %48 = arith.truncf %47 : vector<16x32xf32> to vector<16x32xbf16>
    %c4 = arith.constant 4 : index
    %c0_34 = arith.constant 0 : index
    %c0_35 = arith.constant 0 : index
    %49 = vector.load %arg3[%c4, %c0_34, %c0_35] : memref<6x32x32xbf16, #tpu.memory_space<vmem>>, vector<1x32x32xbf16>
    %50 = vector.shape_cast %49 : vector<1x32x32xbf16> to vector<32x32xbf16>
    %cst_36 = arith.constant dense<0.000000e+00> : vector<16x32xf32>
    %51 = tpu.matmul %48, %50, %cst_36 {dimension_numbers = #tpu.dot_dimension_numbers<[1], [0], [0], [1], [0, 0, 1, 1], [], []>} : vector<16x32xbf16>, vector<32x32xbf16>, vector<16x32xf32> -> vector<16x32xf32>
    %c4_37 = arith.constant 4 : index
    %c0_38 = arith.constant 0 : index
    %52 = vector.load %arg4[%c4_37, %c0_38] : memref<6x32xf32, #tpu.memory_space<vmem>>, vector<1x32xf32>
    %53 = vector.broadcast %52 : vector<1x32xf32> to vector<16x32xf32>
    %54 = arith.addf %51, %53 : vector<16x32xf32>
    %cst_39 = arith.constant 0.000000e+00 : f32
    %55 = vector.broadcast %cst_39 : f32 to vector<16x32xf32>
    %56 = arith.maximumf %54, %55 : vector<16x32xf32>
    %57 = arith.truncf %56 : vector<16x32xf32> to vector<16x32xbf16>
    %c5 = arith.constant 5 : index
    %c0_40 = arith.constant 0 : index
    %c0_41 = arith.constant 0 : index
    %58 = vector.load %arg3[%c5, %c0_40, %c0_41] : memref<6x32x32xbf16, #tpu.memory_space<vmem>>, vector<1x32x32xbf16>
    %59 = vector.shape_cast %58 : vector<1x32x32xbf16> to vector<32x32xbf16>
    %cst_42 = arith.constant dense<0.000000e+00> : vector<16x32xf32>
    %60 = tpu.matmul %57, %59, %cst_42 {dimension_numbers = #tpu.dot_dimension_numbers<[1], [0], [0], [1], [0, 0, 1, 1], [], []>} : vector<16x32xbf16>, vector<32x32xbf16>, vector<16x32xf32> -> vector<16x32xf32>
    %c5_43 = arith.constant 5 : index
    %c0_44 = arith.constant 0 : index
    %61 = vector.load %arg4[%c5_43, %c0_44] : memref<6x32xf32, #tpu.memory_space<vmem>>, vector<1x32xf32>
    %62 = vector.broadcast %61 : vector<1x32xf32> to vector<16x32xf32>
    %63 = arith.addf %60, %62 : vector<16x32xf32>
    %cst_45 = arith.constant 0.000000e+00 : f32
    %64 = vector.broadcast %cst_45 : f32 to vector<16x32xf32>
    %65 = arith.maximumf %63, %64 : vector<16x32xf32>
    %66 = arith.truncf %65 : vector<16x32xf32> to vector<16x32xbf16>
    %c0_46 = arith.constant 0 : index
    %c0_47 = arith.constant 0 : index
    %67 = vector.load %arg5[%c0_46, %c0_47] : memref<32x128xbf16, #tpu.memory_space<vmem>>, vector<32x128xbf16>
    %cst_48 = arith.constant dense<0.000000e+00> : vector<16x128xf32>
    %68 = tpu.matmul %66, %67, %cst_48 {dimension_numbers = #tpu.dot_dimension_numbers<[1], [0], [0], [1], [0, 0, 1, 1], [], []>} : vector<16x32xbf16>, vector<32x128xbf16>, vector<16x128xf32> -> vector<16x128xf32>
    %c0_49 = arith.constant 0 : index
    %c0_50 = arith.constant 0 : index
    %69 = vector.load %arg6[%c0_49, %c0_50] : memref<1x128xf32, #tpu.memory_space<vmem>>, vector<1x128xf32>
    %70 = vector.broadcast %69 : vector<1x128xf32> to vector<16x128xf32>
    %71 = arith.addf %68, %70 : vector<16x128xf32>
    %c0_51 = arith.constant 0 : index
    %c0_52 = arith.constant 0 : index
    %72 = vector.load %arg7[%c0_51, %c0_52] : memref<16x128xf32, #tpu.memory_space<vmem>>, vector<16x128xf32>
    tpu.vector_store %arg7[%c0_51, %c0_52], %71 {strides = array<i32>} : memref<16x128xf32, #tpu.memory_space<vmem>>, vector<16x128xf32>,
    return
  }
}

</mosaic_0001>

<bundles_post_ra>
// kernel: gcn_forward.1
= control target key start
LH: loop header
LB: loop body
LE: loop exit
PB: predicated region body
PF: predicated region fallthrough
CT: control target
= control target key end

     0   :  { %12 = vsyncpa [#allocation3], 0  ;;  %s908_s0 = inlined_call_operand.hbm [shape: bf16[16,16], index: 0, kind: input, shape index: {}]   ;;  %s909_s1 = inlined_call_operand.hbm [shape: bf16[16,32], index: 1, kind: input, shape index: {}]   ;;  %s910_s2 = inlined_call_operand.hbm [shape: bf16[16,16], index: 2, kind: input, shape index: {}]   ;;  %s911_s3 = inlined_call_operand.hbm [shape: bf16[6,32,32], index: 3, kind: input, shape index: {}]   ;;  %s912_s4 = inlined_call_operand.hbm [shape: f32[6,32], index: 4, kind: input, shape index: {}]   ;;  %s913_s5 = inlined_call_operand.hbm [shape: bf16[32,128], index: 5, kind: input, shape index: {}]   ;;  %s914_s6 = inlined_call_operand.hbm [shape: f32[1,128], index: 6, kind: input, shape index: {}]   ;;  %s915_s7 = inlined_call_operand.vmem [shape: f32[16,128], index: 7, kind: output, shape index: {}]  }
   0x1   :  { %13 = vsyncpa [#allocation5], 0 }
   0x2   :  { %14 = vsyncpa [#allocation8], 0 }
   0x3   :  { %15 = vsyncpa [#allocation11], 0  ;;  %s33_s26 = sshll.u32 %s909_s1, 4  ;;  %s805_s27 = smov [#allocation4]   ;;  %s34_s26 = int_to_ptr.hbm [resolvable:$true] %s33_s26 }
   0x4   :  { %s35_s28 = sshll.u32 %s805_s27, 4  ;;  %s59_s8 = sshll.u32 %s911_s3, 4  ;;  %s36_s28 = int_to_ptr.vmem [resolvable:$true] %s35_s28  ;;  %s60_s8 = int_to_ptr.hbm [resolvable:$true] %s59_s8 }
   0x5   :  { %s806_s9 = smov 64   ;;  %s807_s10 = smov 4  }
   0x6   :  { %41 = dma.hbm_to_vmem [thread:$0]  %s34_s26, 128, %s36_s28, [#allocation5], %s806_s9, %s806_s9, %s807_s10  }
   0x7   :  { %s808_s11 = smov [#allocation7]   ;;  %s83_s1 = sshll.u32 %s913_s5, 4  ;;  %s84_s1 = int_to_ptr.hbm [resolvable:$true] %s83_s1 }
   0x8   :  { %s61_s12 = sshll.u32 %s808_s11, 4  ;;  %s20_s16 = sshll.u32 %s908_s0, 4  ;;  %s62_s12 = int_to_ptr.vmem [resolvable:$true] %s61_s12  ;;  %s21_s16 = int_to_ptr.hbm [resolvable:$true] %s20_s16 }
   0x9   :  { %67 = dma.hbm_to_vmem [thread:$0]  %s60_s8, 1536, %s62_s12, [#allocation8], %s806_s9, %s806_s9, %s807_s10  }
   0xa   :  { %s809_s17 = smov [#allocation10]   ;;  %s810_s19 = smov [#allocation2]  }
   0xb   :  { %s85_s18 = sshll.u32 %s809_s17, 4  ;;  %s22_s5 = sshll.u32 %s810_s19, 4  ;;  %s86_s18 = int_to_ptr.vmem [resolvable:$true] %s85_s18  ;;  %s23_s5 = int_to_ptr.vmem [resolvable:$true] %s22_s5 }
   0xc   :  { %91 = dma.hbm_to_vmem [thread:$0]  %s84_s1, 256, %s86_s18, [#allocation11], %s806_s9, %s806_s9, %s807_s10  }
   0xd   :  { %s46_s22 = sshll.u32 %s910_s2, 4  ;;  %s73_s24 = sshll.u32 %s912_s4, 4  ;;  %s47_s22 = int_to_ptr.hbm [resolvable:$true] %s46_s22  ;;  %s74_s24 = int_to_ptr.hbm [resolvable:$true] %s73_s24 }
   0xe   :  { %28 = dma.hbm_to_vmem [thread:$0]  %s21_s16, 128, %s23_s5, [#allocation3], %s806_s9, %s806_s9, %s807_s10  }
   0xf   :  { %s811_s25 = smov [#allocation6]   ;;  %s812_s27 = smov [#allocation9]  }
  0x10   :  { %s48_s26 = sshll.u32 %s811_s25, 4  ;;  %s75_s2 = sshll.u32 %s812_s27, 4  ;;  %s49_s26 = int_to_ptr.vmem [resolvable:$true] %s48_s26  ;;  %s76_s2 = int_to_ptr.vmem [resolvable:$true] %s75_s2 }
  0x11   :  { %54 = dma.hbm_to_vmem [thread:$0]  %s47_s22, 128, %s49_s26, [#allocation5], %s806_s9, %s806_s9, %s807_s10  }
  0x12   :  { %s97_s30 = sshll.u32 %s914_s6, 4  ;;  %s813_s8 = smov [#allocation12]   ;;  %s98_s30 = int_to_ptr.hbm [resolvable:$true] %s97_s30 }
  0x13   :  { %78 = dma.hbm_to_vmem [thread:$0]  %s74_s24, 128, %s76_s2, [#allocation8]  }
  0x14   :  { %s99_s11 = sshll.u32 %s813_s8, 4  ;;  %s100_s11 = int_to_ptr.vmem [resolvable:$true] %s99_s11 }
  0x15   :  { %102 = dma.hbm_to_vmem [thread:$0]  %s98_s30, 16, %s100_s11, [#allocation11]  }
  0x16   :  { %797 = dma.done.wait [#allocation3], 128  }
  0x17   :  { %798 = vsyncadd [#allocation3], 4294967168 }
  0x18   :  { %799 = dma.done.wait [#allocation5], 256  }
  0x19   :  { %800 = vsyncadd [#allocation5], 4294967040 }
  0x1a   :  { %801 = dma.done.wait [#allocation8], 1664  }
  0x1b   :  { %802 = vsyncadd [#allocation8], 4294965632 }
  0x1c   :  { %803 = dma.done.wait [#allocation11], 272  }
  0x1d   :  { %804 = vsyncadd [#allocation11], 4294967024  ;;  %v599_v0 = vld [vmem:[#allocation7 + $0x8] sm:$0xff]  ;;  %v598_v1 = vld [vmem:[#allocation7] sm:$0xff]  ;;  %vm157_vm0 = vcmask 261120   ;;  %vm183_vm1 = vcmask 130048  }
  0x1e   :  { %167 = vmatpush.bf16.msra.mxu0 %v599_v0  ;;  %v597_v2 = vld [vmem:[#allocation4] sm:$0xff]  ;;  %v596_v6 = vld [vmem:[#allocation2] sm:$0xff]  ;;  %v601_v7 = vld [vmem:[#allocation7 + $0x18] sm:$0xff] }
  0x1f   :  { %230 = vmatpush.bf16.msra.mxu2 %v601_v7  ;;  %v600_v8 = vld [vmem:[#allocation7 + $0x10] sm:$0xff]  ;;  %v622_v10 = vld [vmem:[#allocation9] ss:$0 sm:$0xff]  ;;  %v603_v20 = vld [vmem:[#allocation7 + $0x28] sm:$0xff] }
  0x20   :  { %v602_v21 = vld [vmem:[#allocation7 + $0x20] sm:$0xff]  ;;  %v605_v33 = vld [vmem:[#allocation7 + $0x38] sm:$0xff]  ;;  %v604_v34 = vld [vmem:[#allocation7 + $0x30] sm:$0xff] }
  0x21   :  { %v623_v23 = vld [vmem:[#allocation9 + $0x1] ss:$0 sm:$0xff]  ;;  %v624_v36 = vld [vmem:[#allocation9 + $0x2] ss:$0 sm:$0xff]  ;;  %v625_v47 = vld [vmem:[#allocation9 + $0x3] ss:$0 sm:$0xff] }
  0x22   :  { %168 = vmatpush.bf16.msra.mxu0 %v598_v1  ;;  %v606_v54 = vld [vmem:[#allocation6] sm:$0xff]  ;;  %v608_v55 = vld [vmem:[#allocation7 + $0x48] sm:$0xff]  ;;  %v607_v56 = vld [vmem:[#allocation7 + $0x40] sm:$0xff] }
  0x23   :  { %231 = vmatpush.bf16.msra.mxu2 %v600_v8  ;;  %v610_v60 = vld [vmem:[#allocation7 + $0x58] sm:$0xff]  ;;  %v609_v61 = vld [vmem:[#allocation7 + $0x50] sm:$0xff]  ;;  %v626_v63 = vld [vmem:[#allocation9 + $0x4] ss:$0 sm:$0xff] }
  0x24   :  { %v611_v7 = vld [vmem:[#allocation10] sm:$0xff] }
  0x25   :  { %528 = vmatmul.msk.bf16.vlgmr.msra.gmra.mxu0 %vm157_vm0, %v597_v2 }
  0x26   :  { %338 = vmatpush.bf16.msrb.mxu0 %v605_v33 }
  0x2a   :  { %339 = vmatpush.bf16.msrb.mxu0 %v604_v34 }
  0x2e   :  { %458 = vmatpush.bf16.msra.mxu0 %v610_v60 }
  0x32   :  { %459 = vmatpush.bf16.msra.mxu0 %v609_v61 }
  0xa2   :  { %v170_v3 = vpop.f32.mrf.mxu0 }
  0xaa   :  { %v172_v4 = vpop.f32.mrf.mxu0 }
  0xab   :  { %v175_v5 = vpack.c.bf16 %v172_v4, %v170_v3 }
  0xad   :  { %194 = vmatpush.bf16.msra.mxu1 %v175_v5 }
  0xb0   :  { %533 = vmatmul.msk.bf16.vlgmr.msra.gmra.mxu1 %vm183_vm1, %v596_v6 }
  0xb1   :  { %284 = vmatpush.bf16.msrb.mxu1 %v603_v20 }
  0xb5   :  { %285 = vmatpush.bf16.msrb.mxu1 %v602_v21 }
 0x12d   :  { %v196_v9 = vpop.f32.mrf.mxu1 }
 0x12e   :  { %v197_v11 = vadd.f32 %v622_v10, %v196_v9  ;;  %v627_v9 = vld [vmem:[#allocation9 + $0x5] ss:$0 sm:$0xff] }
 0x130   :  { %v201_v14 = vmax.f32 %v197_v11, 0.0 }
 0x135   :  { %v198_v12 = vpop.f32.mrf.mxu1 }
 0x136   :  { %v199_v13 = vadd.f32 %v622_v10, %v198_v12 }
 0x138   :  { %v202_v15 = vmax.f32 %v199_v13, 0.0 }
 0x13a   :  { %v203_v16 = vpack.c.bf16 %v202_v15, %v201_v14 }
 0x13c   :  { %542 = vmatmul.msk.bf16.vlgmr.msra.gmra.mxu2 %vm157_vm0, %v203_v16  ;;  %v628_v16 = vld [vmem:[#allocation12] ss:$0 sm:$0xff] }
 0x1bf   :  { %v233_v17 = vpop.f32.mrf.mxu2 }
 0x1c7   :  { %v235_v18 = vpop.f32.mrf.mxu2 }
 0x1c8   :  { %v238_v19 = vpack.c.bf16 %v235_v18, %v233_v17 }
 0x1ca   :  { %248 = vmatpush.bf16.msra.mxu3 %v238_v19 }
 0x1cd   :  { %543 = vmatmul.msk.bf16.vlgmr.msra.gmra.mxu3 %vm183_vm1, %v596_v6 }
 0x250   :  { %v250_v22 = vpop.f32.mrf.mxu3 }
 0x251   :  { %v251_v24 = vadd.f32 %v623_v23, %v250_v22 }
 0x253   :  { %v255_v27 = vmax.f32 %v251_v24, 0.0 }
 0x258   :  { %v252_v25 = vpop.f32.mrf.mxu3 }
 0x259   :  { %v253_v26 = vadd.f32 %v623_v23, %v252_v25 }
 0x25b   :  { %v256_v28 = vmax.f32 %v253_v26, 0.0 }
 0x25d   :  { %v257_v29 = vpack.c.bf16 %v256_v28, %v255_v27 }
 0x25f   :  { %552 = vmatmul.msk.bf16.vlgmr.msrb.gmra.mxu1 %vm157_vm0, %v257_v29 }
 0x2dc   :  { %v287_v30 = vpop.f32.mrf.mxu1 }
 0x2e4   :  { %v289_v31 = vpop.f32.mrf.mxu1 }
 0x2e5   :  { %v292_v32 = vpack.c.bf16 %v289_v31, %v287_v30 }
 0x2e7   :  { %302 = vmatpush.bf16.msrb.mxu3 %v292_v32 }
 0x2ea   :  { %553 = vmatmul.msk.bf16.vlgmr.msrb.gmra.mxu3 %vm183_vm1, %v596_v6 }
 0x2eb   :  { %419 = vmatpush.bf16.msra.mxu3 %v608_v55 }
 0x2ef   :  { %420 = vmatpush.bf16.msra.mxu3 %v607_v56 }
 0x36d   :  { %v304_v35 = vpop.f32.mrf.mxu3 }
 0x36e   :  { %v305_v37 = vadd.f32 %v624_v36, %v304_v35 }
 0x370   :  { %v309_v40 = vmax.f32 %v305_v37, 0.0 }
 0x375   :  { %v306_v38 = vpop.f32.mrf.mxu3 }
 0x376   :  { %v307_v39 = vadd.f32 %v624_v36, %v306_v38 }
 0x378   :  { %v310_v41 = vmax.f32 %v307_v39, 0.0 }
 0x37a   :  { %v311_v42 = vpack.c.bf16 %v310_v41, %v309_v40 }
 0x37c   :  { %562 = vmatmul.msk.bf16.vlgmr.msrb.gmra.mxu0 %vm157_vm0, %v311_v42 }
 0x3f9   :  { %v341_v43 = vpop.f32.mrf.mxu0 }
 0x401   :  { %v343_v44 = vpop.f32.mrf.mxu0 }
 0x402   :  { %v346_v45 = vpack.c.bf16 %v343_v44, %v341_v43 }
 0x404   :  { %356 = vmatpush.bf16.msrb.mxu2 %v346_v45 }
 0x407   :  { %563 = vmatmul.msk.bf16.vlgmr.msrb.gmra.mxu2 %vm183_vm1, %v596_v6  ;;  %v612_v6 = vld [vmem:[#allocation10 + $0x8] sm:$0xff] }
 0x408   :  { %498 = vmatpush.bf16.msra.mxu2 %v612_v6 }
 0x40c   :  { %499 = vmatpush.bf16.msra.mxu2 %v611_v7 }
 0x48a   :  { %v358_v46 = vpop.f32.mrf.mxu2 }
 0x48b   :  { %v359_v48 = vadd.f32 %v625_v47, %v358_v46 }
 0x48d   :  { %v363_v51 = vmax.f32 %v359_v48, 0.0 }
 0x492   :  { %v360_v49 = vpop.f32.mrf.mxu2 }
 0x493   :  { %v361_v50 = vadd.f32 %v625_v47, %v360_v49 }
 0x495   :  { %v364_v52 = vmax.f32 %v361_v50, 0.0 }
 0x497   :  { %v365_v53 = vpack.c.bf16 %v364_v52, %v363_v51 }
 0x499   :  { %383 = vmatpush.bf16.msra.mxu1 %v365_v53 }
 0x49c   :  { %568 = vmatmul.msk.bf16.vlgmr.msra.gmra.mxu1 %vm183_vm1, %v606_v54 }
 0x519   :  { %v385_v57 = vpop.f32.mrf.mxu1 }
 0x521   :  { %v387_v58 = vpop.f32.mrf.mxu1 }
 0x522   :  { %v390_v59 = vpack.c.bf16 %v387_v58, %v385_v57 }
 0x524   :  { %577 = vmatmul.msk.bf16.vlgmr.msra.gmra.mxu3 %vm157_vm0, %v390_v59 }
 0x5a7   :  { %v422_v62 = vpop.f32.mrf.mxu3 }
 0x5a8   :  { %v423_v0 = vadd.f32 %v626_v63, %v422_v62 }
 0x5aa   :  { %v427_v3 = vmax.f32 %v423_v0, 0.0 }
 0x5af   :  { %v424_v1 = vpop.f32.mrf.mxu3 }
 0x5b0   :  { %v425_v2 = vadd.f32 %v626_v63, %v424_v1 }
 0x5b2   :  { %v428_v4 = vmax.f32 %v425_v2, 0.0 }
 0x5b4   :  { %v429_v5 = vpack.c.bf16 %v428_v4, %v427_v3 }
 0x5b6   :  { %586 = vmatmul.msk.bf16.vlgmr.msra.gmra.mxu0 %vm157_vm0, %v429_v5 }
 0x633   :  { %v461_v8 = vpop.f32.mrf.mxu0 }
 0x634   :  { %v462_v10 = vadd.f32 %v627_v9, %v461_v8 }
 0x636   :  { %v466_v13 = vmax.f32 %v462_v10, 0.0 }
 0x63b   :  { %v463_v11 = vpop.f32.mrf.mxu0 }
 0x63c   :  { %v464_v12 = vadd.f32 %v627_v9, %v463_v11 }
 0x63e   :  { %v467_v14 = vmax.f32 %v464_v12, 0.0 }
 0x640   :  { %v468_v15 = vpack.c.bf16 %v467_v14, %v466_v13 }
 0x642   :  { %595 = vmatmul.msk.bf16.vlgmr.msra.gmra.mxu2 %vm157_vm0, %v468_v15 }
 0x6c5   :  { %v501_v17 = vpop.f32.mrf.mxu2 }
 0x6c6   :  { %v502_v18 = vadd.f32 %v628_v16, %v501_v17 }
 0x6c8   :  { %506 = vst [vmem:[%s915_s7] sm:$0xff] %v502_v18 }
 0x6cd   :  { %v503_v19 = vpop.f32.mrf.mxu2 }
 0x6ce   :  { %v504_v20 = vadd.f32 %v628_v16, %v503_v19 }
 0x6d0   :  { %507 = vst [vmem:[%s915_s7 + $0x8] sm:$0xff] %v504_v20 }
 0x6d1   :  { %512 = vsyncpa [#allocation3], 1 }
 0x6d2   :  { %513 = vsyncpa [#allocation5], 1 }
 0x6d3   :  { %514 = vsyncpa [#allocation8], 1 }
 0x6d4   :  { %515 = vsyncpa [#allocation11], 1 }

</bundles_post_ra>
